<compile_context>
chip_gen: v7x
topology: tpu7x:2x2x1
jax: 0.10.0
libtpu: 0.0.40
codegen_flags: <defaults>
</compile_context>

<pallas_src>
import functools

import jax
import jax.numpy as jnp
from jax.experimental import pallas as pl
from jax.experimental.pallas import tpu as pltpu


def _round_up(n: int, m: int) -> int:
    return ((n + m - 1) // m) * m


def _resfc_kernel(*refs, num_layers: int):
    """Fused ResFCNet forward for one batch tile.

    refs = (x_ref, w0_ref, ..., w{L-1}_ref, o_ref).
    x_ref: (TB, P) f32, weights: (P, P) f32 (zero-padded W.T), o_ref: (TB, P).
    Feature dims are zero-padded to the common lane-dense width P, so the
    PyTorch `cat([x, zeros]) + relu(x @ W.T)` residual is a plain add here
    (the activation's padded tail is exactly zero at every step).
    """
    x_ref = refs[0]
    w_refs = refs[1:1 + num_layers]
    o_ref = refs[1 + num_layers]

    h = x_ref[...]  # (TB, P) f32 — stays resident in vregs for the whole net
    for i in range(num_layers - 1):
        y = jnp.dot(h, w_refs[i][...], preferred_element_type=jnp.float32)
        h = h + jnp.maximum(y, 0.0)  # residual (implicit zero-pad)
    out = jnp.dot(h, w_refs[num_layers - 1][...],
                  preferred_element_type=jnp.float32)
    o_ref[...] = out.astype(o_ref.dtype)


class ResFCNetPallas:
    """Mirror of the PyTorch ResFCNet: num_layers Linear layers (bias=False),
    residual + ReLU on every hidden layer (with zero-pad when the width grows),
    plain Linear on the last layer."""

    def __init__(self, num_layers, layers, bias=False, key=None):
        assert len(layers) == num_layers + 1
        assert not bias, "ResFCNet default is bias=False; bias path not needed."
        for i in range(num_layers - 1):
            assert layers[i] <= layers[i + 1], "Decreasing hidden layer size!"

        self.num_layers = num_layers
        self.layers = list(layers)
        # Common lane-dense padded width (multiple of 128, covers every layer).
        P = max(128, _round_up(max(layers), 128))
        self.pad_dim = P

        key = key if key is not None else jax.random.PRNGKey(0)
        self.weights_t = []    # unpadded (in, out) = W.T, for reference checks
        self.weights_pad = []  # zero-padded (P, P) kernel operands
        for layer in range(num_layers):
            key, sub = jax.random.split(key)
            fan_in = layers[layer]
            bound = 1.0 / float(fan_in) ** 0.5  # nn.Linear default init range
            w = jax.random.uniform(
                sub, (layers[layer + 1], layers[layer]),
                minval=-bound, maxval=bound, dtype=jnp.float32
            )  # PyTorch layout (out, in)
            w_t = jnp.asarray(w.T)  # (in, out)
            self.weights_t.append(w_t)
            wp = jnp.zeros((P, P), jnp.float32)
            wp = wp.at[:layers[layer], :layers[layer + 1]].set(w_t)
            self.weights_pad.append(wp)

        d_in, d_out, L = layers[0], layers[-1], num_layers

        @jax.jit
        def _forward(x, *weights_pad):
            B = x.shape[0]
            # Batch tile: sublane-aligned, capped so (TB, P) activations plus
            # the weight stack stay comfortably inside VMEM.
            TB = min(512, _round_up(B, 8))
            Bp = _round_up(B, TB)
            # Zero-pad input to (Bp, P): lane-dense features, sublane-aligned batch.
            x_p = jnp.zeros((Bp, P), jnp.float32).at[:B, :d_in].set(
                x.astype(jnp.float32))

            grid = (Bp // TB,)
            x_spec = pl.BlockSpec((TB, P), lambda i: (i, 0))
            # Weights: same block for every grid step -> stay resident in VMEM.
            w_spec = pl.BlockSpec((P, P), lambda i: (0, 0))
            out_spec = pl.BlockSpec((TB, P), lambda i: (i, 0))

            out_p = pl.pallas_call(
                functools.partial(_resfc_kernel, num_layers=L),
                out_shape=jax.ShapeDtypeStruct((Bp, P), jnp.float32),
                grid=grid,
                in_specs=[x_spec] + [w_spec] * L,
                out_specs=out_spec,
                compiler_params=pltpu.CompilerParams(
                    dimension_semantics=("parallel",)),
            )(x_p, *weights_pad)
            return out_p[:B, :d_out]

        self._forward = _forward

    def forward(self, x):
        return self._forward(x, *self.weights_pad)


if __name__ == "__main__":
    key = jax.random.PRNGKey(0)
    k_in, k_params = jax.random.split(key)

    # Small shapes consistent with ResFCNet: non-decreasing hidden widths.
    num_layers = 3
    layers = [32, 64, 64, 16]
    batch = 8

    x = jax.random.normal(k_in, (batch, layers[0]), dtype=jnp.float32)

    net = ResFCNetPallas(num_layers, layers, bias=False, key=k_params)
    out = jax.block_until_ready(net.forward(x))

    # Pure-JAX reference with exact torch ResFCNet semantics.
    ref = x
    for i in range(num_layers - 1):
        y = jnp.maximum(ref @ net.weights_t[i], 0.0)
        din, dout = ref.shape[1], y.shape[1]
        if din != dout:
            ref = jnp.concatenate(
                [ref, jnp.zeros((batch, dout - din), jnp.float32)], axis=1) + y
        else:
            ref = ref + y
    ref = ref @ net.weights_t[-1]

    assert out.shape == (batch, layers[-1])
    assert jnp.allclose(out, ref, atol=1e-4, rtol=1e-4), float(
        jnp.max(jnp.abs(out - ref)))

    print("KERNEL_OK")
</pallas_src>

<mosaic_0001>
module attributes {stable_mosaic.version = 11 : i64} {
  func.func @_resfc_kernel(%arg0: i32, %arg1: memref<8x128xf32, #tpu.memory_space<vmem>>, %arg2: memref<128x128xf32, #tpu.memory_space<vmem>>, %arg3: memref<128x128xf32, #tpu.memory_space<vmem>>, %arg4: memref<128x128xf32, #tpu.memory_space<vmem>>, %arg5: memref<8x128xf32, #tpu.memory_space<vmem>>) attributes {dimension_semantics = [#tpu.dimension_semantics<parallel>], iteration_bounds = array<i64: 1>, scalar_prefetch = 0 : i64, scratch_operands = 0 : i64, tpu.core_type = #tpu.core_type<tc>, window_params = [{transform_indices = @transform_0, window_bounds = array<i64: 8, 128>}, {pipeline_mode = #tpu.pipeline_mode<synchronous>, transform_indices = @transform_1, window_bounds = array<i64: 128, 128>}, {pipeline_mode = #tpu.pipeline_mode<synchronous>, transform_indices = @transform_2, window_bounds = array<i64: 128, 128>}, {pipeline_mode = #tpu.pipeline_mode<synchronous>, transform_indices = @transform_3, window_bounds = array<i64: 128, 128>}, {transform_indices = @transform_4, window_bounds = array<i64: 8, 128>}]} {
    %c0 = arith.constant 0 : index
    %c0_0 = arith.constant 0 : index
    %0 = vector.load %arg1[%c0, %c0_0] : memref<8x128xf32, #tpu.memory_space<vmem>>, vector<8x128xf32>
    %c0_1 = arith.constant 0 : index
    %c0_2 = arith.constant 0 : index
    %1 = vector.load %arg2[%c0_1, %c0_2] : memref<128x128xf32, #tpu.memory_space<vmem>>, vector<128x128xf32>
    %cst = arith.constant dense<0.000000e+00> : vector<8x128xf32>
    %2 = tpu.matmul %0, %1, %cst {dimension_numbers = #tpu.dot_dimension_numbers<[1], [0], [0], [1], [0, 0, 1, 1], [], []>} : vector<8x128xf32>, vector<128x128xf32>, vector<8x128xf32> -> vector<8x128xf32>
    %cst_3 = arith.constant 0.000000e+00 : f32
    %3 = vector.broadcast %cst_3 : f32 to vector<8x128xf32>
    %4 = arith.maximumf %2, %3 : vector<8x128xf32>
    %5 = arith.addf %0, %4 : vector<8x128xf32>
    %c0_4 = arith.constant 0 : index
    %c0_5 = arith.constant 0 : index
    %6 = vector.load %arg3[%c0_4, %c0_5] : memref<128x128xf32, #tpu.memory_space<vmem>>, vector<128x128xf32>
    %cst_6 = arith.constant dense<0.000000e+00> : vector<8x128xf32>
    %7 = tpu.matmul %5, %6, %cst_6 {dimension_numbers = #tpu.dot_dimension_numbers<[1], [0], [0], [1], [0, 0, 1, 1], [], []>} : vector<8x128xf32>, vector<128x128xf32>, vector<8x128xf32> -> vector<8x128xf32>
    %cst_7 = arith.constant 0.000000e+00 : f32
    %8 = vector.broadcast %cst_7 : f32 to vector<8x128xf32>
    %9 = arith.maximumf %7, %8 : vector<8x128xf32>
    %10 = arith.addf %5, %9 : vector<8x128xf32>
    %c0_8 = arith.constant 0 : index
    %c0_9 = arith.constant 0 : index
    %11 = vector.load %arg4[%c0_8, %c0_9] : memref<128x128xf32, #tpu.memory_space<vmem>>, vector<128x128xf32>
    %cst_10 = arith.constant dense<0.000000e+00> : vector<8x128xf32>
    %12 = tpu.matmul %10, %11, %cst_10 {dimension_numbers = #tpu.dot_dimension_numbers<[1], [0], [0], [1], [0, 0, 1, 1], [], []>} : vector<8x128xf32>, vector<128x128xf32>, vector<8x128xf32> -> vector<8x128xf32>
    %c0_11 = arith.constant 0 : index
    %c0_12 = arith.constant 0 : index
    %13 = vector.load %arg5[%c0_11, %c0_12] : memref<8x128xf32, #tpu.memory_space<vmem>>, vector<8x128xf32>
    tpu.vector_store %arg5[%c0_11, %c0_12], %12 {strides = array<i32>} : memref<8x128xf32, #tpu.memory_space<vmem>>, vector<8x128xf32>,
    return
  }
  func.func @transform_0(%arg0: i32) -> (i32, i32) {
    %c0_i32 = arith.constant 0 : i32
    %c0_i32_0 = arith.constant 0 : i32
    return %arg0, %c0_i32 : i32, i32
  }
  func.func @transform_1(%arg0: i32) -> (i32, i32) {
    %c0_i32 = arith.constant 0 : i32
    %c0_i32_0 = arith.constant 0 : i32
    %c0_i32_1 = arith.constant 0 : i32
    return %c0_i32, %c0_i32_0 : i32, i32
  }
  func.func @transform_2(%arg0: i32) -> (i32, i32) {
    %c0_i32 = arith.constant 0 : i32
    %c0_i32_0 = arith.constant 0 : i32
    %c0_i32_1 = arith.constant 0 : i32
    return %c0_i32, %c0_i32_0 : i32, i32
  }
  func.func @transform_3(%arg0: i32) -> (i32, i32) {
    %c0_i32 = arith.constant 0 : i32
    %c0_i32_0 = arith.constant 0 : i32
    %c0_i32_1 = arith.constant 0 : i32
    return %c0_i32, %c0_i32_0 : i32, i32
  }
  func.func @transform_4(%arg0: i32) -> (i32, i32) {
    %c0_i32 = arith.constant 0 : i32
    %c0_i32_0 = arith.constant 0 : i32
    return %arg0, %c0_i32 : i32, i32
  }
}

</mosaic_0001>

<bundles_post_ra>
// kernel: _forward.1
= control target key start
LH: loop header
LB: loop body
LE: loop exit
PB: predicated region body
PF: predicated region fallthrough
CT: control target
= control target key end

     0   :  { %9 = vsyncpa [#allocation3], 0  ;;  %s801_s0 = inlined_call_operand.vmem [shape: f32[8,128], index: 0, kind: input, shape index: {}]   ;;  %s802_s1 = inlined_call_operand.hbm [shape: f32[128,128], index: 1, kind: input, shape index: {}]   ;;  %s803_s2 = inlined_call_operand.hbm [shape: f32[128,128], index: 2, kind: input, shape index: {}]   ;;  %s804_s3 = inlined_call_operand.hbm [shape: f32[128,128], index: 3, kind: input, shape index: {}]   ;;  %s805_s4 = inlined_call_operand.hbm [shape: f32[8,128], index: 4, kind: output, shape index: {}]  }
   0x1   :  { %10 = vsyncpa [#allocation6], 0 }
   0x2   :  { %11 = vsyncpa [#allocation4], 0  ;;  %s670_s15 = smov [#allocation5]   ;;  %s671_s17 = smov [#allocation2]  }
   0x3   :  { %s31_s16 = sshll.u32 %s670_s15, 4  ;;  %s19_s18 = sshll.u32 %s671_s17, 4  ;;  %s32_s16 = int_to_ptr.vmem [resolvable:$true] %s31_s16  ;;  %s704_s18 = int_to_ptr.vmem [resolvable:$true] %s19_s18 }
   0x4   :  { %s576_s21 = scalar_lea.hbm %s803_s2, 2048 }
   0x5   :  { %p577_p0 = scmp.ne.s32.totalorder %s803_s2, %s576_s21  ;;  %p580_p1 = scmp.lt.u32.totalorder %s576_s21, %s803_s2 }
   0x7   :  { %p582_p2 = pnand %p580_p1, %p577_p0 }
   0x9   :  { %585 = shalt.err (!%p582_p2)
}
   0xa   :  { %s586_s26 = scalar_lea.vmem %s32_s16, 2048  ;;  %p591_p4 = scmp.lt.s32.totalorder %s32_s16, %s32_s16 }
   0xb   :  { %p587_p3 = scmp.ne.s32.totalorder %s32_s16, %s586_s26  ;;  %p592_p5 = scmp.lt.s32.totalorder %s586_s26, %s586_s26 }
   0xd   :  { %p593_p6 = por %p592_p5, %p591_p4 }
   0xf   :  { %p594_p7 = pnand %p593_p6, %p587_p3 }
  0x11   :  { %597 = shalt.err (!%p594_p7)
}
  0x12   :  { %s672_s27 = smov 128   ;;  %s673_s28 = smov 8  }
  0x13   :  { %37 = dma.hbm_to_vmem [thread:$0]  %s803_s2, 2048, %s32_s16, [#allocation6], %s672_s27, %s672_s27, %s673_s28  }
  0x14   :  { %s598_s7 = scalar_lea.hbm %s802_s1, 2048 }
  0x15   :  { %p599_p8 = scmp.ne.s32.totalorder %s802_s1, %s598_s7  ;;  %p602_p9 = scmp.lt.u32.totalorder %s598_s7, %s802_s1 }
  0x17   :  { %p604_p10 = pnand %p602_p9, %p599_p8 }
  0x19   :  { %607 = shalt.err (!%p604_p10)
}
  0x1a   :  { %s608_s12 = scalar_lea.vmem %s704_s18, 2048  ;;  %p613_p12 = scmp.lt.s32.totalorder %s704_s18, %s704_s18 }
  0x1b   :  { %p609_p11 = scmp.ne.s32.totalorder %s704_s18, %s608_s12  ;;  %p614_p13 = scmp.lt.s32.totalorder %s608_s12, %s608_s12 }
  0x1d   :  { %p615_p0 = por %p614_p13, %p613_p12 }
  0x1f   :  { %p616_p1 = pnand %p615_p0, %p609_p11 }
  0x21   :  { %619 = shalt.err (!%p616_p1)
}
  0x22   :  { %25 = dma.hbm_to_vmem [thread:$0]  %s802_s1, 2048, %s704_s18, [#allocation3], %s672_s27, %s672_s27, %s673_s28  }
  0x23   :  { %s674_s14 = smov [#allocation7]   ;;  %s620_s19 = scalar_lea.hbm %s804_s3, 2048 }
  0x24   :  { %s43_s15 = sshll.u32 %s674_s14, 4  ;;  %p621_p2 = scmp.ne.s32.totalorder %s804_s3, %s620_s19  ;;  %s44_s15 = int_to_ptr.vmem [resolvable:$true] %s43_s15 }
  0x25   :  { %p624_p3 = scmp.lt.u32.totalorder %s620_s19, %s804_s3 }
  0x27   :  { %p626_p4 = pnand %p624_p3, %p621_p2 }
  0x29   :  { %629 = shalt.err (!%p626_p4)
}
  0x2a   :  { %s630_s24 = scalar_lea.vmem %s44_s15, 2048  ;;  %p635_p6 = scmp.lt.s32.totalorder %s44_s15, %s44_s15 }
  0x2b   :  { %p631_p5 = scmp.ne.s32.totalorder %s44_s15, %s630_s24  ;;  %p636_p7 = scmp.lt.s32.totalorder %s630_s24, %s630_s24 }
  0x2d   :  { %p637_p8 = por %p636_p7, %p635_p6 }
  0x2f   :  { %p638_p9 = pnand %p637_p8, %p631_p5 }
  0x31   :  { %641 = shalt.err (!%p638_p9)
}
  0x32   :  { %49 = dma.hbm_to_vmem [thread:$0]  %s804_s3, 2048, %s44_s15, [#allocation6], %s672_s27, %s672_s27, %s673_s28  }
  0x33   :  { %664 = dma.done.wait [#allocation3], 2048  }
  0x34   :  { %665 = vsyncadd [#allocation3], 4294965248 }
  0x35   :  { %666 = dma.done.wait [#allocation6], 4096  }
  0x36   :  { %667 = vsyncadd [#allocation6], 4294963200  ;;  %v675_v0 = vmov 0.0|0.0   ;;  %vm676_vm0 = vmmov 0   ;;  %v677_v1 = vmov 0.0   ;;  %v60_v2 = vld [vmem:[#allocation2] sm:$0xff] }
  0x37   :  { %495 = vmatprep.subr.bf16.mxu0 %v675_v0  ;;  %422 = vmatprep.mubr.msk.f32.mxu0 %vm676_vm0, %v677_v1  ;;  %v61_v3 = vld [vmem:[#allocation2 + $0x8] sm:$0xff]  ;;  %v62_v4 = vld [vmem:[#allocation2 + $0x10] sm:$0xff]  ;;  %v63_v6 = vld [vmem:[#allocation2 + $0x18] sm:$0xff] }
  0x38   :  { %519 = vmatprep.subr.bf16.mxu1 %v675_v0  ;;  %457 = vmatprep.mubr.msk.f32.mxu1 %vm676_vm0, %v677_v1  ;;  %v496_v5 = vpack.c.bf16 %v61_v3, %v60_v2  ;;  %v499_v7 = vpack.c.bf16 %v63_v6, %v62_v4  ;;  %v64_v8 = vld [vmem:[#allocation2 + $0x20] sm:$0xff]  ;;  %v65_v9 = vld [vmem:[#allocation2 + $0x28] sm:$0xff]  ;;  %v150_v12 = vld [vmem:[#allocation5 + $0x10] sm:$0xff] }
  0x39   :  { %v148_v10 = vld [vmem:[#allocation5] sm:$0xff]  ;;  %v149_v11 = vld [vmem:[#allocation5 + $0x8] sm:$0xff]  ;;  %v151_v13 = vld [vmem:[#allocation5 + $0x18] sm:$0xff]  ;;  %v502_v14 = vpack.c.bf16 %v65_v9, %v64_v8 }
  0x3a   :  { %497 = vmatpush3.bf16.msra.mxu0 %v496_v5  ;;  %v520_v15 = vpack.c.bf16 %v149_v11, %v148_v10  ;;  %v66_v16 = vld [vmem:[#allocation2 + $0x30] sm:$0xff]  ;;  %v67_v17 = vld [vmem:[#allocation2 + $0x38] sm:$0xff]  ;;  %v523_v18 = vpack.c.bf16 %v151_v13, %v150_v12  ;;  %v152_v19 = vld [vmem:[#allocation5 + $0x20] sm:$0xff] }
  0x3b   :  { %498 = vmatprep.subr.bf16.mxu0 %v675_v0  ;;  %v153_v20 = vld [vmem:[#allocation5 + $0x28] sm:$0xff]  ;;  %v505_v21 = vpack.c.bf16 %v67_v17, %v66_v16  ;;  %v68_v22 = vld [vmem:[#allocation2 + $0x40] sm:$0xff]  ;;  %v154_v25 = vld [vmem:[#allocation5 + $0x30] sm:$0xff] }
  0x3c   :  { %521 = vmatpush3.bf16.msra.mxu1 %v520_v15  ;;  %v69_v23 = vld [vmem:[#allocation2 + $0x48] sm:$0xff]  ;;  %v526_v24 = vpack.c.bf16 %v153_v20, %v152_v19  ;;  %v155_v26 = vld [vmem:[#allocation5 + $0x38] sm:$0xff]  ;;  %v70_v28 = vld [vmem:[#allocation2 + $0x50] sm:$0xff] }
  0x3d   :  { %522 = vmatprep.subr.bf16.mxu1 %v675_v0  ;;  %v508_v27 = vpack.c.bf16 %v69_v23, %v68_v22  ;;  %v71_v29 = vld [vmem:[#allocation2 + $0x58] sm:$0xff]  ;;  %v529_v30 = vpack.c.bf16 %v155_v26, %v154_v25  ;;  %v156_v31 = vld [vmem:[#allocation5 + $0x40] sm:$0xff]  ;;  %v157_v32 = vld [vmem:[#allocation5 + $0x48] sm:$0xff] }
  0x3e   :  { %500 = vmatpush3.bf16.msra.mxu0 %v499_v7  ;;  %v511_v33 = vpack.c.bf16 %v71_v29, %v70_v28  ;;  %v72_v34 = vld [vmem:[#allocation2 + $0x60] sm:$0xff]  ;;  %v73_v35 = vld [vmem:[#allocation2 + $0x68] sm:$0xff]  ;;  %v532_v36 = vpack.c.bf16 %v157_v32, %v156_v31  ;;  %v158_v37 = vld [vmem:[#allocation5 + $0x50] sm:$0xff] }
  0x3f   :  { %501 = vmatprep.subr.bf16.mxu0 %v675_v0  ;;  %v159_v38 = vld [vmem:[#allocation5 + $0x58] sm:$0xff]  ;;  %v514_v39 = vpack.c.bf16 %v73_v35, %v72_v34  ;;  %v74_v40 = vld [vmem:[#allocation2 + $0x70] sm:$0xff]  ;;  %v160_v43 = vld [vmem:[#allocation5 + $0x60] sm:$0xff] }
  0x40   :  { %524 = vmatpush3.bf16.msra.mxu1 %v523_v18  ;;  %v75_v41 = vld [vmem:[#allocation2 + $0x78] sm:$0xff]  ;;  %v535_v42 = vpack.c.bf16 %v159_v38, %v158_v37  ;;  %v161_v44 = vld [vmem:[#allocation5 + $0x68] sm:$0xff]  ;;  %v59_v47 = vld [vmem:[%s801_s0] sm:$0xff]  ;;  %s678_s0 = smov [#allocation8]  }
  0x41   :  { %525 = vmatprep.subr.bf16.mxu1 %v675_v0  ;;  %v517_v45 = vpack.c.bf16 %v75_v41, %v74_v40  ;;  %v538_v46 = vpack.c.bf16 %v161_v44, %v160_v43  ;;  %v162_v48 = vld [vmem:[#allocation5 + $0x70] sm:$0xff]  ;;  %v163_v49 = vld [vmem:[#allocation5 + $0x78] sm:$0xff]  ;;  %v236_v51 = vld [vmem:[#allocation7] sm:$0xff]  ;;  %s329_s26 = sshll.u32 %s678_s0, 4  ;;  %s330_s26 = int_to_ptr.vmem [resolvable:$true] %s329_s26 }
  0x42   :  { %503 = vmatpush3.bf16.msra.mxu0 %v502_v14  ;;  %v541_v50 = vpack.c.bf16 %v163_v49, %v162_v48  ;;  %v237_v52 = vld [vmem:[#allocation7 + $0x8] sm:$0xff]  ;;  %v238_v53 = vld [vmem:[#allocation7 + $0x10] sm:$0xff]  ;;  %v239_v55 = vld [vmem:[#allocation7 + $0x18] sm:$0xff]  ;;  %s642_s27 = scalar_lea.vmem %s330_s26, 128  ;;  %p647_p11 = scmp.lt.s32.totalorder %s330_s26, %s330_s26 }
  0x43   :  { %504 = vmatprep.subr.bf16.mxu0 %v675_v0  ;;  %v544_v54 = vpack.c.bf16 %v237_v52, %v236_v51  ;;  %v547_v56 = vpack.c.bf16 %v239_v55, %v238_v53  ;;  %v240_v57 = vld [vmem:[#allocation7 + $0x20] sm:$0xff]  ;;  %v241_v58 = vld [vmem:[#allocation7 + $0x28] sm:$0xff]  ;;  %v242_v60 = vld [vmem:[#allocation7 + $0x30] sm:$0xff]  ;;  %p643_p10 = scmp.ne.s32.totalorder %s330_s26, %s642_s27  ;;  %p648_p12 = scmp.lt.s32.totalorder %s642_s27, %s642_s27 }
  0x44   :  { %527 = vmatpush3.bf16.msra.mxu1 %v526_v24  ;;  %v550_v59 = vpack.c.bf16 %v241_v58, %v240_v57  ;;  %v243_v61 = vld [vmem:[#allocation7 + $0x38] sm:$0xff]  ;;  %v244_v63 = vld [vmem:[#allocation7 + $0x40] sm:$0xff]  ;;  %v246_v3 = vld [vmem:[#allocation7 + $0x50] sm:$0xff] }
  0x45   :  { %528 = vmatprep.subr.bf16.mxu1 %v675_v0  ;;  %v553_v62 = vpack.c.bf16 %v243_v61, %v242_v60  ;;  %v247_v4 = vld [vmem:[#allocation7 + $0x58] sm:$0xff]  ;;  %v248_v6 = vld [vmem:[#allocation7 + $0x60] sm:$0xff]  ;;  %v249_v7 = vld [vmem:[#allocation7 + $0x68] sm:$0xff]  ;;  %p649_p13 = por %p648_p12, %p647_p11 }
  0x46   :  { %506 = vmatpush3.bf16.msra.mxu0 %v505_v21  ;;  %v559_v5 = vpack.c.bf16 %v247_v4, %v246_v3  ;;  %v562_v8 = vpack.c.bf16 %v249_v7, %v248_v6  ;;  %v250_v13 = vld [vmem:[#allocation7 + $0x70] sm:$0xff]  ;;  %v251_v14 = vld [vmem:[#allocation7 + $0x78] sm:$0xff] }
  0x47   :  { %507 = vmatprep.subr.bf16.mxu0 %v675_v0  ;;  %v565_v15 = vpack.c.bf16 %v251_v14, %v250_v13  ;;  %p650_p0 = pnand %p649_p13, %p643_p10 }
  0x48   :  { %530 = vmatpush3.bf16.msra.mxu1 %v529_v30 }
  0x49   :  { %531 = vmatprep.subr.bf16.mxu1 %v675_v0 }
  0x4a   :  { %509 = vmatpush3.bf16.msra.mxu0 %v508_v27 }
  0x4b   :  { %510 = vmatprep.subr.bf16.mxu0 %v675_v0 }
  0x4c   :  { %533 = vmatpush3.bf16.msra.mxu1 %v532_v36 }
  0x4d   :  { %534 = vmatprep.subr.bf16.mxu1 %v675_v0 }
  0x4e   :  { %512 = vmatpush3.bf16.msra.mxu0 %v511_v33 }
  0x4f   :  { %513 = vmatprep.subr.bf16.mxu0 %v675_v0 }
  0x50   :  { %536 = vmatpush3.bf16.msra.mxu1 %v535_v42 }
  0x51   :  { %537 = vmatprep.subr.bf16.mxu1 %v675_v0 }
  0x52   :  { %515 = vmatpush3.bf16.msra.mxu0 %v514_v39 }
  0x53   :  { %516 = vmatprep.subr.bf16.mxu0 %v675_v0 }
  0x54   :  { %539 = vmatpush3.bf16.msra.mxu1 %v538_v46 }
  0x55   :  { %540 = vmatprep.subr.bf16.mxu1 %v675_v0 }
  0x56   :  { %518 = vmatpush3.bf16.msra.mxu0 %v517_v45 }
  0x57   :  { %543 = vmatprep.subr.bf16.mxu0 %v675_v0 }
  0x58   :  { %542 = vmatpush3.bf16.msra.mxu1 %v541_v50 }
  0x59   :  { %423 = vmatmul.mubr.f32.vlgmr.msra.gmra.mrb[0].mxu0 %v59_v47 }
  0x5a   :  { %492 = vmatprep.mubr.msk.f32.mxu0 %vm676_vm0, %v677_v1  ;;  %545 = vmatpush3.bf16.msra.mxu0 %v544_v54  ;;  %v245_v1 = vld [vmem:[#allocation7 + $0x48] sm:$0xff] }
  0x5b   :  { %546 = vmatprep.subr.bf16.mxu0 %v675_v0  ;;  %v556_v2 = vpack.c.bf16 %v245_v1, %v244_v63 }
  0x5e   :  { %548 = vmatpush3.bf16.msra.mxu0 %v547_v56 }
  0x5f   :  { %549 = vmatprep.subr.bf16.mxu0 %v675_v0 }
  0x62   :  { %551 = vmatpush3.bf16.msra.mxu0 %v550_v59 }
  0x63   :  { %552 = vmatprep.subr.bf16.mxu0 %v675_v0 }
  0x66   :  { %554 = vmatpush3.bf16.msra.mxu0 %v553_v62 }
  0x67   :  { %555 = vmatprep.subr.bf16.mxu0 %v675_v0 }
  0x6a   :  { %557 = vmatpush3.bf16.msra.mxu0 %v556_v2 }
  0x6b   :  { %558 = vmatprep.subr.bf16.mxu0 %v675_v0 }
  0x6e   :  { %560 = vmatpush3.bf16.msra.mxu0 %v559_v5 }
  0x6f   :  { %561 = vmatprep.subr.bf16.mxu0 %v675_v0 }
  0x72   :  { %563 = vmatpush3.bf16.msra.mxu0 %v562_v8 }
  0x73   :  { %564 = vmatprep.subr.bf16.mxu0 %v675_v0 }
  0x76   :  { %566 = vmatpush3.bf16.msra.mxu0 %v565_v15 }
 0x12c   :  { %v142_v9 = vpop.f32.mrb[0].mxu0 }
 0x12d   :  { %v146_v10 = vmax.f32 %v142_v9, 0.0  ;;  %v424_v11 = vpop.f32.mrb[1].mxu0 }
 0x12f   :  { %v147_v12 = vadd.f32 %v146_v10, %v59_v47 }
 0x131   :  { %458 = vmatmul.mubr.f32.vlgmr.msra.gmra.mrb[0].mxu1 %v147_v12 }
 0x204   :  { %v230_v16 = vpop.f32.mrb[0].mxu1 }
 0x205   :  { %v234_v17 = vmax.f32 %v230_v16, 0.0  ;;  %v459_v18 = vpop.f32.mrb[1].mxu1 }
 0x207   :  { %v235_v19 = vadd.f32 %v234_v17, %v147_v12 }
 0x209   :  { %493 = vmatmul.mubr.f32.vlgmr.msra.gmra.mrb[2].mxu0 %v235_v19 }
 0x2dc   :  { %v318_v20 = vpop.f32.mrb[2].mxu0 }
 0x2dd   :  { %322 = vst [vmem:[#allocation8] sm:$0xff] %v318_v20  ;;  %v494_v0 = vpop.f32.mrb[3].mxu0 }
 0x2de   :  { %653 = shalt.err (!%p650_p0)
}
 0x2df   :  { %s654_s30 = scalar_lea.hbm %s805_s4, 128 }
 0x2e0   :  { %p655_p1 = scmp.ne.s32.totalorder %s805_s4, %s654_s30  ;;  %p658_p2 = scmp.lt.u32.totalorder %s654_s30, %s805_s4 }
 0x2e2   :  { %p660_p3 = pnand %p658_p2, %p655_p1 }
 0x2e4   :  { %663 = shalt.err (!%p660_p3)
}
 0x2e5   :  { %332 = dma.vmem_to_hbm [thread:$0]  %s330_s26, 128, %s805_s4, [#allocation4]  }
 0x2e6   :  { %668 = dma.done.wait [#allocation4], 128  }
 0x2e7   :  { %669 = vsyncadd [#allocation4], 4294967168 }
 0x2e8   :  { %336 = vsyncpa [#allocation3], 1 }
 0x2e9   :  { %337 = vsyncpa [#allocation6], 1 }
 0x2ea   :  { %338 = vsyncpa [#allocation4], 1 }

</bundles_post_ra>
